<compile_context>
chip_gen: v7x
topology: tpu7x:2x2x1
jax: 0.10.0
libtpu: 0.0.40
codegen_flags: <defaults>
</compile_context>

<pallas_src>
import jax
import jax.numpy as jnp
from jax.experimental import pallas as pl
from jax.experimental.pallas import tpu as pltpu


def _bilinear_matrix(in_size: int, scale: int) -> jnp.ndarray:
    """(out, in) matrix M with M @ v == bilinear upsample of v (align_corners=False)."""
    out_size = in_size * scale
    o = jnp.arange(out_size, dtype=jnp.float32)
    src = (o + 0.5) / float(scale) - 0.5
    src = jnp.maximum(src, 0.0)                       # torch clamps negative src idx to 0
    i0f = jnp.floor(src)
    frac = src - i0f
    i0 = jnp.minimum(i0f.astype(jnp.int32), in_size - 1)
    i1 = jnp.minimum(i0 + 1, in_size - 1)
    m = ((1.0 - frac)[:, None] * jax.nn.one_hot(i0, in_size, dtype=jnp.float32)
         + frac[:, None] * jax.nn.one_hot(i1, in_size, dtype=jnp.float32))
    return m


def _upsample_slice_kernel(w_ref, b_ref, x_ref, uh_ref, uwt_ref, o_ref):
    # w_ref:   (Cout, Cin)        SMEM f32   1x1 conv weight with BN scale folded in
    # b_ref:   (Cout,)            SMEM f32   folded eval-mode BN bias
    # x_ref:   (Nb, Cin, H, W)    VMEM       NCHW input block (bf16 or f32)
    # uh_ref:  (Ho, H)            VMEM f32   bilinear row-interpolation matrix
    # uwt_ref: (W, Wo)            VMEM f32   bilinear col-interpolation matrix (transposed)
    # o_ref:   (Nb, Cout, Ho, Wo) VMEM       NCHW output block
    nb, cin, h, w = x_ref.shape
    cout, ho, wo = o_ref.shape[1], o_ref.shape[2], o_ref.shape[3]

    x = x_ref[...].astype(jnp.float32)                      # (Nb, Cin, H, W), f32 math

    # ---- 1x1 conv (slice+concat folded into block-diagonal weight) + BN + ReLU ----
    # De-kroned: exactly Cin*Cout scalar-broadcast FMAs on the VPU; weights from SMEM.
    z_cols = []
    for co in range(cout):
        acc = w_ref[co, 0] * x[:, 0]                         # (Nb, H, W)
        for ci in range(1, cin):
            acc = acc + w_ref[co, ci] * x[:, ci]
        z_cols.append(jnp.maximum(acc + b_ref[co], 0.0))
    z = jnp.stack(z_cols, axis=1)                            # (Nb, Cout, H, W)
    z = z.reshape(nb * cout, h, w)                           # leading-dim merge: free

    # ---- exact separable bilinear upsample: two batched MXU matmuls over Nb*Cout ----
    uh = jnp.broadcast_to(uh_ref[...], (nb * cout, ho, h))
    uwt = jnp.broadcast_to(uwt_ref[...], (nb * cout, w, wo))
    zh = jnp.einsum('bph,bhw->bpw', uh, z,
                    preferred_element_type=jnp.float32)      # (Nb*Cout, Ho, W)
    out = jnp.einsum('bpw,bwq->bpq', zh, uwt,
                     preferred_element_type=jnp.float32)     # (Nb*Cout, Ho, Wo)

    o_ref[...] = out.reshape(nb, cout, ho, wo).astype(o_ref.dtype)


def upsample_with_slice(x_nchw, w_full, bn_scale, bn_bias, upstride, *, batch_block=None):
    """x_nchw: (N, Cin, H, W) f32/bf16. w_full: (Cout, Cin) block-diagonal 1x1 conv weight."""
    n, cin, h, w = x_nchw.shape
    cout = w_full.shape[0]
    ho, wo = h * upstride, w * upstride

    # Fold the eval-mode BN scale into the 1x1 conv weight; bias stays separate.
    w_scaled = (w_full * bn_scale[:, None]).astype(jnp.float32)   # (Cout, Cin)  -> SMEM
    bias = bn_bias.astype(jnp.float32)                            # (Cout,)      -> SMEM

    uh = _bilinear_matrix(h, upstride)                            # (Ho, H)
    uwt = _bilinear_matrix(w, upstride).T                         # (W, Wo)

    # Fat batch blocks amortize per-step overhead; keep >=2 steps for v7x megacore.
    if batch_block is None:
        batch_block = max(1, min(8, pl.cdiv(n, 2)))
    nb = min(batch_block, n)
    grid = (pl.cdiv(n, nb),)

    return pl.pallas_call(
        _upsample_slice_kernel,
        out_shape=jax.ShapeDtypeStruct((n, cout, ho, wo), jnp.float32),
        grid=grid,
        in_specs=[
            pl.BlockSpec(memory_space=pltpu.MemorySpace.SMEM),           # w_scaled
            pl.BlockSpec(memory_space=pltpu.MemorySpace.SMEM),           # bias
            pl.BlockSpec((nb, cin, h, w), lambda i: (i, 0, 0, 0)),       # x (NCHW, direct)
            pl.BlockSpec((ho, h), lambda i: (0, 0)),                     # UH  (grid-invariant)
            pl.BlockSpec((w, wo), lambda i: (0, 0)),                     # UW^T (grid-invariant)
        ],
        out_specs=pl.BlockSpec((nb, cout, ho, wo), lambda i: (i, 0, 0, 0)),
        compiler_params=pltpu.CompilerParams(dimension_semantics=("parallel",)),
    )(w_scaled, bias, x_nchw, uh, uwt)


def _reference(x_nchw, w_full, bn_scale, bn_bias, upstride):
    """Pure-JAX reference of the same math (conv1x1 + BN + ReLU + bilinear x upstride)."""
    z = jnp.einsum('oc,nchw->nohw', w_full, x_nchw)
    z = jnp.maximum(z * bn_scale[None, :, None, None] + bn_bias[None, :, None, None], 0.0)
    uh = _bilinear_matrix(x_nchw.shape[2], upstride)
    uw = _bilinear_matrix(x_nchw.shape[3], upstride)
    z = jnp.einsum('ph,nchw->ncpw', uh, z)
    z = jnp.einsum('qw,ncpw->ncpq', uw, z)
    return z


if __name__ == "__main__":
    # Small module-consistent config: 4 batch items so the batch-blocked grid (Nb=2,
    # 2 grid steps) is actually exercised.
    N, Cin, H, W = 4, 4, 16, 16
    Cout = 4
    upstride = 2

    key = jax.random.PRNGKey(0)
    kx, k1, k2, kg, kb, km, kv = jax.random.split(key, 7)

    x_f32 = jax.random.normal(kx, (N, Cin, H, W), dtype=jnp.float32)
    # bf16 activations halve input HBM/VMEM traffic; in-kernel math stays f32.
    x = x_f32.astype(jnp.bfloat16)

    # Deterministic parameters (synthetic, no checkpoint):
    # branch 1: 1 -> 1 channels ; branch 2: (Cin-1) -> (Cout-1) channels
    w1 = jax.random.normal(k1, (1, 1), dtype=jnp.float32) * 0.5
    w2 = jax.random.normal(k2, (Cout - 1, Cin - 1), dtype=jnp.float32) * 0.5
    # Block-diagonal combined 1x1 conv weight reproduces slice + concat exactly.
    w_full = jnp.zeros((Cout, Cin), jnp.float32)
    w_full = w_full.at[:1, :1].set(w1).at[1:, 1:].set(w2)

    # eval-mode BatchNorm params folded into per-channel scale/bias
    gamma = jax.random.uniform(kg, (Cout,), minval=0.5, maxval=1.5, dtype=jnp.float32)
    beta = jax.random.normal(kb, (Cout,), dtype=jnp.float32) * 0.1
    r_mean = jax.random.normal(km, (Cout,), dtype=jnp.float32) * 0.1
    r_var = jax.random.uniform(kv, (Cout,), minval=0.5, maxval=1.5, dtype=jnp.float32)
    eps = 1e-5
    bn_scale = gamma / jnp.sqrt(r_var + eps)
    bn_bias = beta - r_mean * bn_scale

    out = jax.block_until_ready(upsample_with_slice(x, w_full, bn_scale, bn_bias, upstride))

    # Reference consumes the same bf16-rounded activations (upcast to f32) so the check
    # isolates kernel correctness rather than the activation quantization choice.
    ref = jax.block_until_ready(
        _reference(x.astype(jnp.float32), w_full, bn_scale, bn_bias, upstride))

    assert out.shape == (N, Cout, H * upstride, W * upstride), out.shape
    err = float(jnp.max(jnp.abs(out - ref)))
    assert jnp.allclose(out, ref, atol=2e-5, rtol=2e-5), err

    print("KERNEL_OK")
</pallas_src>

<mosaic_0001>
module attributes {stable_mosaic.version = 11 : i64} {
  func.func @_upsample_slice_kernel(%arg0: i32, %arg1: memref<4x4xf32, #tpu.memory_space<smem>>, %arg2: memref<4xf32, #tpu.memory_space<smem>>, %arg3: memref<2x4x16x16xbf16, #tpu.memory_space<vmem>>, %arg4: memref<32x16xf32, #tpu.memory_space<vmem>>, %arg5: memref<16x32xf32, #tpu.memory_space<vmem>>, %arg6: memref<2x4x32x32xf32, #tpu.memory_space<vmem>>) attributes {dimension_semantics = [#tpu.dimension_semantics<parallel>], iteration_bounds = array<i64: 2>, scalar_prefetch = 0 : i64, scratch_operands = 0 : i64, tpu.core_type = #tpu.core_type<tc>, window_params = [{transform_indices = @transform_0, window_bounds = array<i64: 4, 4>}, {transform_indices = @transform_1, window_bounds = array<i64: 4>}, {transform_indices = @transform_2, window_bounds = array<i64: 2, 4, 16, 16>}, {pipeline_mode = #tpu.pipeline_mode<synchronous>, transform_indices = @transform_3, window_bounds = array<i64: 32, 16>}, {pipeline_mode = #tpu.pipeline_mode<synchronous>, transform_indices = @transform_4, window_bounds = array<i64: 16, 32>}, {transform_indices = @transform_5, window_bounds = array<i64: 2, 4, 32, 32>}]} {
    %c0 = arith.constant 0 : index
    %c0_0 = arith.constant 0 : index
    %c0_1 = arith.constant 0 : index
    %c0_2 = arith.constant 0 : index
    %0 = vector.load %arg3[%c0, %c0_0, %c0_1, %c0_2] : memref<2x4x16x16xbf16, #tpu.memory_space<vmem>>, vector<2x4x16x16xbf16>
    %1 = arith.extf %0 : vector<2x4x16x16xbf16> to vector<2x4x16x16xf32>
    %c0_3 = arith.constant 0 : index
    %c0_4 = arith.constant 0 : index
    %2 = memref.load %arg1[%c0_3, %c0_4] : memref<4x4xf32, #tpu.memory_space<smem>>
    %3 = vector.extract_strided_slice %1 {offsets = [0, 0, 0, 0], sizes = [2, 1, 16, 16], strides = [1, 1, 1, 1]} : vector<2x4x16x16xf32> to vector<2x1x16x16xf32>
    %4 = vector.shape_cast %3 : vector<2x1x16x16xf32> to vector<2x16x16xf32>
    %5 = vector.broadcast %2 : f32 to vector<2x16x16xf32>
    %6 = arith.mulf %5, %4 : vector<2x16x16xf32>
    %c0_5 = arith.constant 0 : index
    %c1 = arith.constant 1 : index
    %7 = memref.load %arg1[%c0_5, %c1] : memref<4x4xf32, #tpu.memory_space<smem>>
    %8 = vector.extract_strided_slice %1 {offsets = [0, 1, 0, 0], sizes = [2, 1, 16, 16], strides = [1, 1, 1, 1]} : vector<2x4x16x16xf32> to vector<2x1x16x16xf32>
    %9 = vector.shape_cast %8 : vector<2x1x16x16xf32> to vector<2x16x16xf32>
    %10 = vector.broadcast %7 : f32 to vector<2x16x16xf32>
    %11 = arith.mulf %10, %9 : vector<2x16x16xf32>
    %12 = arith.addf %6, %11 : vector<2x16x16xf32>
    %c0_6 = arith.constant 0 : index
    %c2 = arith.constant 2 : index
    %13 = memref.load %arg1[%c0_6, %c2] : memref<4x4xf32, #tpu.memory_space<smem>>
    %14 = vector.extract_strided_slice %1 {offsets = [0, 2, 0, 0], sizes = [2, 1, 16, 16], strides = [1, 1, 1, 1]} : vector<2x4x16x16xf32> to vector<2x1x16x16xf32>
    %15 = vector.shape_cast %14 : vector<2x1x16x16xf32> to vector<2x16x16xf32>
    %16 = vector.broadcast %13 : f32 to vector<2x16x16xf32>
    %17 = arith.mulf %16, %15 : vector<2x16x16xf32>
    %18 = arith.addf %12, %17 : vector<2x16x16xf32>
    %c0_7 = arith.constant 0 : index
    %c3 = arith.constant 3 : index
    %19 = memref.load %arg1[%c0_7, %c3] : memref<4x4xf32, #tpu.memory_space<smem>>
    %20 = vector.extract_strided_slice %1 {offsets = [0, 3, 0, 0], sizes = [2, 1, 16, 16], strides = [1, 1, 1, 1]} : vector<2x4x16x16xf32> to vector<2x1x16x16xf32>
    %21 = vector.shape_cast %20 : vector<2x1x16x16xf32> to vector<2x16x16xf32>
    %22 = vector.broadcast %19 : f32 to vector<2x16x16xf32>
    %23 = arith.mulf %22, %21 : vector<2x16x16xf32>
    %24 = arith.addf %18, %23 : vector<2x16x16xf32>
    %c0_8 = arith.constant 0 : index
    %25 = memref.load %arg2[%c0_8] : memref<4xf32, #tpu.memory_space<smem>>
    %26 = vector.broadcast %25 : f32 to vector<2x16x16xf32>
    %27 = arith.addf %24, %26 : vector<2x16x16xf32>
    %cst = arith.constant 0.000000e+00 : f32
    %28 = vector.broadcast %cst : f32 to vector<2x16x16xf32>
    %29 = arith.maximumf %27, %28 : vector<2x16x16xf32>
    %c1_9 = arith.constant 1 : index
    %c0_10 = arith.constant 0 : index
    %30 = memref.load %arg1[%c1_9, %c0_10] : memref<4x4xf32, #tpu.memory_space<smem>>
    %31 = vector.extract_strided_slice %1 {offsets = [0, 0, 0, 0], sizes = [2, 1, 16, 16], strides = [1, 1, 1, 1]} : vector<2x4x16x16xf32> to vector<2x1x16x16xf32>
    %32 = vector.shape_cast %31 : vector<2x1x16x16xf32> to vector<2x16x16xf32>
    %33 = vector.broadcast %30 : f32 to vector<2x16x16xf32>
    %34 = arith.mulf %33, %32 : vector<2x16x16xf32>
    %c1_11 = arith.constant 1 : index
    %c1_12 = arith.constant 1 : index
    %35 = memref.load %arg1[%c1_11, %c1_12] : memref<4x4xf32, #tpu.memory_space<smem>>
    %36 = vector.extract_strided_slice %1 {offsets = [0, 1, 0, 0], sizes = [2, 1, 16, 16], strides = [1, 1, 1, 1]} : vector<2x4x16x16xf32> to vector<2x1x16x16xf32>
    %37 = vector.shape_cast %36 : vector<2x1x16x16xf32> to vector<2x16x16xf32>
    %38 = vector.broadcast %35 : f32 to vector<2x16x16xf32>
    %39 = arith.mulf %38, %37 : vector<2x16x16xf32>
    %40 = arith.addf %34, %39 : vector<2x16x16xf32>
    %c1_13 = arith.constant 1 : index
    %c2_14 = arith.constant 2 : index
    %41 = memref.load %arg1[%c1_13, %c2_14] : memref<4x4xf32, #tpu.memory_space<smem>>
    %42 = vector.extract_strided_slice %1 {offsets = [0, 2, 0, 0], sizes = [2, 1, 16, 16], strides = [1, 1, 1, 1]} : vector<2x4x16x16xf32> to vector<2x1x16x16xf32>
    %43 = vector.shape_cast %42 : vector<2x1x16x16xf32> to vector<2x16x16xf32>
    %44 = vector.broadcast %41 : f32 to vector<2x16x16xf32>
    %45 = arith.mulf %44, %43 : vector<2x16x16xf32>
    %46 = arith.addf %40, %45 : vector<2x16x16xf32>
    %c1_15 = arith.constant 1 : index
    %c3_16 = arith.constant 3 : index
    %47 = memref.load %arg1[%c1_15, %c3_16] : memref<4x4xf32, #tpu.memory_space<smem>>
    %48 = vector.extract_strided_slice %1 {offsets = [0, 3, 0, 0], sizes = [2, 1, 16, 16], strides = [1, 1, 1, 1]} : vector<2x4x16x16xf32> to vector<2x1x16x16xf32>
    %49 = vector.shape_cast %48 : vector<2x1x16x16xf32> to vector<2x16x16xf32>
    %50 = vector.broadcast %47 : f32 to vector<2x16x16xf32>
    %51 = arith.mulf %50, %49 : vector<2x16x16xf32>
    %52 = arith.addf %46, %51 : vector<2x16x16xf32>
    %c1_17 = arith.constant 1 : index
    %53 = memref.load %arg2[%c1_17] : memref<4xf32, #tpu.memory_space<smem>>
    %54 = vector.broadcast %53 : f32 to vector<2x16x16xf32>
    %55 = arith.addf %52, %54 : vector<2x16x16xf32>
    %cst_18 = arith.constant 0.000000e+00 : f32
    %56 = vector.broadcast %cst_18 : f32 to vector<2x16x16xf32>
    %57 = arith.maximumf %55, %56 : vector<2x16x16xf32>
    %c2_19 = arith.constant 2 : index
    %c0_20 = arith.constant 0 : index
    %58 = memref.load %arg1[%c2_19, %c0_20] : memref<4x4xf32, #tpu.memory_space<smem>>
    %59 = vector.extract_strided_slice %1 {offsets = [0, 0, 0, 0], sizes = [2, 1, 16, 16], strides = [1, 1, 1, 1]} : vector<2x4x16x16xf32> to vector<2x1x16x16xf32>
    %60 = vector.shape_cast %59 : vector<2x1x16x16xf32> to vector<2x16x16xf32>
    %61 = vector.broadcast %58 : f32 to vector<2x16x16xf32>
    %62 = arith.mulf %61, %60 : vector<2x16x16xf32>
    %c2_21 = arith.constant 2 : index
    %c1_22 = arith.constant 1 : index
    %63 = memref.load %arg1[%c2_21, %c1_22] : memref<4x4xf32, #tpu.memory_space<smem>>
    %64 = vector.extract_strided_slice %1 {offsets = [0, 1, 0, 0], sizes = [2, 1, 16, 16], strides = [1, 1, 1, 1]} : vector<2x4x16x16xf32> to vector<2x1x16x16xf32>
    %65 = vector.shape_cast %64 : vector<2x1x16x16xf32> to vector<2x16x16xf32>
    %66 = vector.broadcast %63 : f32 to vector<2x16x16xf32>
    %67 = arith.mulf %66, %65 : vector<2x16x16xf32>
    %68 = arith.addf %62, %67 : vector<2x16x16xf32>
    %c2_23 = arith.constant 2 : index
    %c2_24 = arith.constant 2 : index
    %69 = memref.load %arg1[%c2_23, %c2_24] : memref<4x4xf32, #tpu.memory_space<smem>>
    %70 = vector.extract_strided_slice %1 {offsets = [0, 2, 0, 0], sizes = [2, 1, 16, 16], strides = [1, 1, 1, 1]} : vector<2x4x16x16xf32> to vector<2x1x16x16xf32>
    %71 = vector.shape_cast %70 : vector<2x1x16x16xf32> to vector<2x16x16xf32>
    %72 = vector.broadcast %69 : f32 to vector<2x16x16xf32>
    %73 = arith.mulf %72, %71 : vector<2x16x16xf32>
    %74 = arith.addf %68, %73 : vector<2x16x16xf32>
    %c2_25 = arith.constant 2 : index
    %c3_26 = arith.constant 3 : index
    %75 = memref.load %arg1[%c2_25, %c3_26] : memref<4x4xf32, #tpu.memory_space<smem>>
    %76 = vector.extract_strided_slice %1 {offsets = [0, 3, 0, 0], sizes = [2, 1, 16, 16], strides = [1, 1, 1, 1]} : vector<2x4x16x16xf32> to vector<2x1x16x16xf32>
    %77 = vector.shape_cast %76 : vector<2x1x16x16xf32> to vector<2x16x16xf32>
    %78 = vector.broadcast %75 : f32 to vector<2x16x16xf32>
    %79 = arith.mulf %78, %77 : vector<2x16x16xf32>
    %80 = arith.addf %74, %79 : vector<2x16x16xf32>
    %c2_27 = arith.constant 2 : index
    %81 = memref.load %arg2[%c2_27] : memref<4xf32, #tpu.memory_space<smem>>
    %82 = vector.broadcast %81 : f32 to vector<2x16x16xf32>
    %83 = arith.addf %80, %82 : vector<2x16x16xf32>
    %cst_28 = arith.constant 0.000000e+00 : f32
    %84 = vector.broadcast %cst_28 : f32 to vector<2x16x16xf32>
    %85 = arith.maximumf %83, %84 : vector<2x16x16xf32>
    %c3_29 = arith.constant 3 : index
    %c0_30 = arith.constant 0 : index
    %86 = memref.load %arg1[%c3_29, %c0_30] : memref<4x4xf32, #tpu.memory_space<smem>>
    %87 = vector.extract_strided_slice %1 {offsets = [0, 0, 0, 0], sizes = [2, 1, 16, 16], strides = [1, 1, 1, 1]} : vector<2x4x16x16xf32> to vector<2x1x16x16xf32>
    %88 = vector.shape_cast %87 : vector<2x1x16x16xf32> to vector<2x16x16xf32>
    %89 = vector.broadcast %86 : f32 to vector<2x16x16xf32>
    %90 = arith.mulf %89, %88 : vector<2x16x16xf32>
    %c3_31 = arith.constant 3 : index
    %c1_32 = arith.constant 1 : index
    %91 = memref.load %arg1[%c3_31, %c1_32] : memref<4x4xf32, #tpu.memory_space<smem>>
    %92 = vector.extract_strided_slice %1 {offsets = [0, 1, 0, 0], sizes = [2, 1, 16, 16], strides = [1, 1, 1, 1]} : vector<2x4x16x16xf32> to vector<2x1x16x16xf32>
    %93 = vector.shape_cast %92 : vector<2x1x16x16xf32> to vector<2x16x16xf32>
    %94 = vector.broadcast %91 : f32 to vector<2x16x16xf32>
    %95 = arith.mulf %94, %93 : vector<2x16x16xf32>
    %96 = arith.addf %90, %95 : vector<2x16x16xf32>
    %c3_33 = arith.constant 3 : index
    %c2_34 = arith.constant 2 : index
    %97 = memref.load %arg1[%c3_33, %c2_34] : memref<4x4xf32, #tpu.memory_space<smem>>
    %98 = vector.extract_strided_slice %1 {offsets = [0, 2, 0, 0], sizes = [2, 1, 16, 16], strides = [1, 1, 1, 1]} : vector<2x4x16x16xf32> to vector<2x1x16x16xf32>
    %99 = vector.shape_cast %98 : vector<2x1x16x16xf32> to vector<2x16x16xf32>
    %100 = vector.broadcast %97 : f32 to vector<2x16x16xf32>
    %101 = arith.mulf %100, %99 : vector<2x16x16xf32>
    %102 = arith.addf %96, %101 : vector<2x16x16xf32>
    %c3_35 = arith.constant 3 : index
    %c3_36 = arith.constant 3 : index
    %103 = memref.load %arg1[%c3_35, %c3_36] : memref<4x4xf32, #tpu.memory_space<smem>>
    %104 = vector.extract_strided_slice %1 {offsets = [0, 3, 0, 0], sizes = [2, 1, 16, 16], strides = [1, 1, 1, 1]} : vector<2x4x16x16xf32> to vector<2x1x16x16xf32>
    %105 = vector.shape_cast %104 : vector<2x1x16x16xf32> to vector<2x16x16xf32>
    %106 = vector.broadcast %103 : f32 to vector<2x16x16xf32>
    %107 = arith.mulf %106, %105 : vector<2x16x16xf32>
    %108 = arith.addf %102, %107 : vector<2x16x16xf32>
    %c3_37 = arith.constant 3 : index
    %109 = memref.load %arg2[%c3_37] : memref<4xf32, #tpu.memory_space<smem>>
    %110 = vector.broadcast %109 : f32 to vector<2x16x16xf32>
    %111 = arith.addf %108, %110 : vector<2x16x16xf32>
    %cst_38 = arith.constant 0.000000e+00 : f32
    %112 = vector.broadcast %cst_38 : f32 to vector<2x16x16xf32>
    %113 = arith.maximumf %111, %112 : vector<2x16x16xf32>
    %114 = vector.shape_cast %29 : vector<2x16x16xf32> to vector<2x1x16x16xf32>
    %115 = vector.shape_cast %57 : vector<2x16x16xf32> to vector<2x1x16x16xf32>
    %116 = vector.shape_cast %85 : vector<2x16x16xf32> to vector<2x1x16x16xf32>
    %117 = vector.shape_cast %113 : vector<2x16x16xf32> to vector<2x1x16x16xf32>
    %118 = tpu.concatenate %114, %115, %116, %117 in 1 : vector<2x1x16x16xf32>, vector<2x1x16x16xf32>, vector<2x1x16x16xf32>, vector<2x1x16x16xf32> -> vector<2x4x16x16xf32>
    %119 = vector.shape_cast %118 : vector<2x4x16x16xf32> to vector<8x16x16xf32>
    %c0_39 = arith.constant 0 : index
    %c0_40 = arith.constant 0 : index
    %120 = vector.load %arg4[%c0_39, %c0_40] : memref<32x16xf32, #tpu.memory_space<vmem>>, vector<32x16xf32>
    %121 = vector.shape_cast %120 : vector<32x16xf32> to vector<1x32x16xf32>
    %122 = vector.broadcast %121 : vector<1x32x16xf32> to vector<8x32x16xf32>
    %c0_41 = arith.constant 0 : index
    %c0_42 = arith.constant 0 : index
    %123 = vector.load %arg5[%c0_41, %c0_42] : memref<16x32xf32, #tpu.memory_space<vmem>>, vector<16x32xf32>
    %124 = vector.shape_cast %123 : vector<16x32xf32> to vector<1x16x32xf32>
    %125 = vector.broadcast %124 : vector<1x16x32xf32> to vector<8x16x32xf32>
    "tpu.trace_start"() <{level = 10 : i32, message = "bph,bhw->bpw"}> : () -> ()
    %cst_43 = arith.constant dense<0.000000e+00> : vector<8x32x16xf32>
    %126 = tpu.matmul %122, %119, %cst_43 {dimension_numbers = #tpu.dot_dimension_numbers<[2], [1], [1], [2], [0, 0, 0, 1, 1, 2], [0], [0]>} : vector<8x32x16xf32>, vector<8x16x16xf32>, vector<8x32x16xf32> -> vector<8x32x16xf32>
    "tpu.trace_stop"() : () -> ()
    "tpu.trace_start"() <{level = 10 : i32, message = "bpw,bwq->bpq"}> : () -> ()
    %cst_44 = arith.constant dense<0.000000e+00> : vector<8x32x32xf32>
    %127 = tpu.matmul %126, %125, %cst_44 {dimension_numbers = #tpu.dot_dimension_numbers<[2], [1], [1], [2], [0, 0, 0, 1, 1, 2], [0], [0]>} : vector<8x32x16xf32>, vector<8x16x32xf32>, vector<8x32x32xf32> -> vector<8x32x32xf32>
    "tpu.trace_stop"() : () -> ()
    %128 = vector.shape_cast %127 : vector<8x32x32xf32> to vector<2x4x32x32xf32>
    %c0_45 = arith.constant 0 : index
    %c0_46 = arith.constant 0 : index
    %c0_47 = arith.constant 0 : index
    %c0_48 = arith.constant 0 : index
    %129 = vector.load %arg6[%c0_45, %c0_46, %c0_47, %c0_48] : memref<2x4x32x32xf32, #tpu.memory_space<vmem>>, vector<2x4x32x32xf32>
    tpu.vector_store %arg6[%c0_45, %c0_46, %c0_47, %c0_48], %128 {strides = array<i32>} : memref<2x4x32x32xf32, #tpu.memory_space<vmem>>, vector<2x4x32x32xf32>,
    return
  }
  func.func @transform_0(%arg0: i32) -> (i32, i32) {
    %c0_i32 = arith.constant 0 : i32
    %c0_i32_0 = arith.constant 0 : i32
    %c0_i32_1 = arith.constant 0 : i32
    return %c0_i32, %c0_i32_0 : i32, i32
  }
  func.func @transform_1(%arg0: i32) -> i32 {
    %c0_i32 = arith.constant 0 : i32
    %c0_i32_0 = arith.constant 0 : i32
    return %c0_i32 : i32
  }
  func.func @transform_2(%arg0: i32) -> (i32, i32, i32, i32) {
    %c0_i32 = arith.constant 0 : i32
    %c0_i32_0 = arith.constant 0 : i32
    %c0_i32_1 = arith.constant 0 : i32
    %c0_i32_2 = arith.constant 0 : i32
    return %arg0, %c0_i32, %c0_i32_0, %c0_i32_1 : i32, i32, i32, i32
  }
  func.func @transform_3(%arg0: i32) -> (i32, i32) {
    %c0_i32 = arith.constant 0 : i32
    %c0_i32_0 = arith.constant 0 : i32
    %c0_i32_1 = arith.constant 0 : i32
    return %c0_i32, %c0_i32_0 : i32, i32
  }
  func.func @transform_4(%arg0: i32) -> (i32, i32) {
    %c0_i32 = arith.constant 0 : i32
    %c0_i32_0 = arith.constant 0 : i32
    %c0_i32_1 = arith.constant 0 : i32
    return %c0_i32, %c0_i32_0 : i32, i32
  }
  func.func @transform_5(%arg0: i32) -> (i32, i32, i32, i32) {
    %c0_i32 = arith.constant 0 : i32
    %c0_i32_0 = arith.constant 0 : i32
    %c0_i32_1 = arith.constant 0 : i32
    %c0_i32_2 = arith.constant 0 : i32
    return %arg0, %c0_i32, %c0_i32_0, %c0_i32_1 : i32, i32, i32, i32
  }
}

</mosaic_0001>

<bundles_post_ra>
// kernel: tpu_custom_call.1
= control target key start
LH: loop header
LB: loop body
LE: loop exit
PB: predicated region body
PF: predicated region fallthrough
CT: control target
= control target key end

     0   :  { %10 = vsyncpa [#allocation5], 0  ;;  %s3512_s0 = inlined_call_operand.vmem [shape: f32[4,4], index: 0, kind: input, shape index: {}]   ;;  %s3513_s1 = inlined_call_operand.vmem [shape: f32[4], index: 1, kind: input, shape index: {}]   ;;  %s3514_s2 = inlined_call_operand.hbm [shape: bf16[4,4,16,16], index: 2, kind: input, shape index: {}]   ;;  %s3515_s3 = inlined_call_operand.vmem [shape: f32[32,16], index: 3, kind: input, shape index: {}]   ;;  %s3516_s4 = inlined_call_operand.vmem [shape: f32[16,32], index: 4, kind: input, shape index: {}]   ;;  %s3517_s5 = inlined_call_operand.hbm [shape: f32[4,4,32,32], index: 5, kind: output, shape index: {}]  }
   0x1   :  { %11 = vsyncpa [#allocation7], 0 }
   0x2   :  { %12 = vsyncpa [#allocation3], 0 }
   0x3   :  { %14 = vsyncpa [#allocation3 + $0x1], 0 }
   0x4   :  { %15 = vsyncpa [#allocation4], 0 }
   0x5   :  { %17 = vsyncpa [#allocation4 + $0x1], 0  ;;  %s2817_s18 = smov 0   ;;  %s2819_s19 = smov 0  }
   0x6   :  { %s2821_s20 = smov 0   ;;  %s2823_s21 = smov 0  }
   0x7 LB: > { %s2838_s22 = sadd.s32 4294967295, %s2777_s21   ;;  %s2107_s23 = sadd.s32 4294967294, %s2777_s21   ;;  %s2777_s21 = sphi %s2823_s21, %s3543_s21   ;;  %s2773_s20 = sphi %s2821_s20, %s3542_s20   ;;  %s2769_s19 = sphi %s2819_s19, %s3541_s19   ;;  %s2765_s18 = sphi %s2817_s18, %s3540_s18  }
   0x8   : > { %s2842_s24 = sadd.s32 1, %s2777_s21   ;;  %s72_s25 = sadd.s32 1, %s2773_s20 }
   0x9   : > { %s69_s26 = ssub.s32 %s2777_s21, %s2842_s24  ;;  %p79_p0 = scmp.ne.s32.totalorder %s2773_s20, %s2769_s19 }
   0xa   : > { %p70_p1 = scmp.eq.s32.totalorder %s69_s26, 0  ;;  %p80_p2 = scmp.eq.s32.totalorder %s2777_s21, 0 }
   0xb   : > { %p85_p3 = scmp.ne.s32.totalorder %s2769_s19, %s2765_s18  ;;  %p3518_p4 = scmp.eq.s32.totalorder %s2838_s22, 0 }
   0xc   : > { %s2854_s27 = scalar_select %p70_p1, %s2773_s20, %s72_s25  }
   0xd   : > { %p2856_p5 = por %p80_p2, %p79_p0  ;;  %p2862_p6 = por %p3518_p4, %p85_p3 }
   0xe   : > { %p151_p7 = scmp.eq.s32.totalorder %s2838_s22, 1  ;;  %p157_p8 = scmp.eq.s32.totalorder %s2107_s23, 1 }
   0xf   : > { %s3524_s29 = scalar_select %p2862_p6, 1, 0 }
  0x10   : > { %p2108_p9 = scmp.ge.s32.totalorder %s2777_s21, 1  ;;  %p164_p10 = scmp.lt.s32.totalorder %s2777_s21, 3 }
  0x11   : > { %p2869_p11 = por %p151_p7, %p79_p0  ;;  %p2873_p12 = por %p157_p8, %p85_p3 }
  0x12   : > { %p2877_p13 = pnand %p2108_p9, %p164_p10  ;;  %s177_s10 = sshll.u32 %s3512_s0, 4  ;;  %s178_s10 = int_to_ptr.vmem [resolvable:$true] %s177_s10 }
  0x13   : > { %s3525_s30 = scalar_select %p2869_p11, 1, 0 }
  0x14   : > { %s3526_s6 = scalar_select %p2873_p12, 1, 0 }
  0x15   : > { %s3527_s7 = scalar_select %p2877_p13, 1, 0 }
  0x16   : > { %p2584_p1 = pneg %p2877_p13  ;;  %p2601_p2 = scmp.lt.s32.totalorder %s2777_s21, 2 }
  0x17   : > { %s188_s14 = sshll.u32 %s3513_s1, 4  ;;  %s2643_s16 = scalar_lea.vmem %s178_s10, 64  ;;  %s189_s14 = int_to_ptr.vmem [resolvable:$true] %s188_s14 }
  0x18   : > { %p2890_p7 = pnand %p2584_p1, %p3518_p4  ;;  %p2899_p3 = pnand %p2601_p2, %p2856_p5 }
  0x19   : > { %p2644_p8 = scmp.ne.s32.totalorder %s178_s10, %s2643_s16  ;;  %p2651_p0 = scmp.lt.s32.totalorder %s178_s10, %s178_s10 }
  0x1a   : > { %s3529_s15 = scalar_select %p2899_p3, 1, 0 }
  0x1b   : > { %p2645_p9 = pneg %p2890_p7  ;;  %p2652_p4 = scmp.lt.s32.totalorder %s2643_s16, %s2643_s16 }
  0x1d   : > { %p2646_p10 = pnand %p2645_p9, %p2644_p8  ;;  %p2653_p12 = por %p2652_p4, %p2651_p0 }
  0x1f   : > { %p2647_p1 = pneg %p2646_p10 }
  0x21   : > { %p2654_p11 = pnand %p2653_p12, %p2647_p1 }
  0x23   : > { %2657 = shalt.err (!%p2654_p11)
}
  0x24   : > { %s2779_s17 = smov [#allocation2]   ;;  %s205_s23 = sand.u32 1, %s2773_s20  }
  0x25   : > { %2587 = dma.vmem_to_smem (!%p2890_p7), %s178_s10, 64, %s2779_s17, [#allocation5]  }
  0x26   : > { %s2658_s25 = scalar_lea.vmem %s189_s14, 16  ;;  %p2666_p8 = scmp.lt.s32.totalorder %s189_s14, %s189_s14 }
  0x27   : > { %p2659_p5 = scmp.ne.s32.totalorder %s189_s14, %s2658_s25  ;;  %p2667_p10 = scmp.lt.s32.totalorder %s2658_s25, %s2658_s25 }
  0x29   : > { %p2661_p2 = pnand %p2659_p5, %p2645_p9  ;;  %p2668_p13 = por %p2667_p10, %p2666_p8 }
  0x2b   : > { %p2662_p6 = pneg %p2661_p2 }
  0x2d   : > { %p2669_p3 = pnand %p2668_p13, %p2662_p6 }
  0x2f   : > { %2672 = shalt.err (!%p2669_p3)
}
  0x30   : > { %s2780_s26 = smov [#allocation6]   ;;  %s2112_s28 = sshll.u32 %s205_s23, 6 }
  0x31   : > { %2590 = dma.vmem_to_smem (!%p2890_p7), %s189_s14, 16, %s2780_s26, [#allocation7]  }
  0x32   : > { %s2210_s8 = sshll.u32 %s2777_s21, 10  ;;  %s209_s13 = scalar_lea.vmem [#allocation8], %s2112_s28 }
  0x33   : > { %s2920_s12 = scalar_lea.hbm %s3514_s2, %s2210_s8  ;;  %s217_s16 = sshll.u32 %s209_s13, 4  ;;  %s2922_s16 = int_to_ptr.vmem [resolvable:$true] %s217_s16 }
  0x34   : > { %s2924_s11 = scalar_lea.sflag [#allocation3], %s205_s23  ;;  %s2673_s17 = scalar_lea.hbm %s2920_s12, 1024 }
  0x35   : > { %p2674_p4 = scmp.ne.s32.totalorder %s2920_s12, %s2673_s17  ;;  %p3530_p6 = scmp.ne.s32.totalorder %s3529_s15, 0 }
  0x36   : > { %s2678_s26 = scalar_lea.hbm %s3514_s2, 2048  ;;  %p2679_p0 = scmp.lt.u32.totalorder %s2920_s12, %s3514_s2 }
  0x37   : > { %p2675_p11 = pneg %p3530_p6  ;;  %p2680_p7 = scmp.lt.u32.totalorder %s2678_s26, %s2673_s17 }
  0x38   : > { %p2682_p9 = scmp.lt.u32.totalorder %s2673_s17, %s2920_s12 }
  0x39   : > { %p2676_p12 = pnand %p2675_p11, %p2674_p4  ;;  %p2681_p3 = por %p2680_p7, %p2679_p0 }
  0x3b   : > { %p2677_p13 = pneg %p2676_p12  ;;  %p2683_p1 = por %p2682_p9, %p2681_p3 }
  0x3d   : > { %p2684_p5 = pnand %p2683_p1, %p2677_p13 }
  0x3f   : > { %2687 = shalt.err (!%p2684_p5)
}
  0x40   : > { %s2688_s23 = scalar_lea.vmem %s2922_s16, 1024  ;;  %s2781_s28 = smov [#allocation8]  }
  0x41   : > { %p2689_p2 = scmp.ne.s32.totalorder %s2922_s16, %s2688_s23  ;;  %s2693_s10 = sshll.u32 %s2781_s28, 4  ;;  %s2694_s10 = int_to_ptr.vmem [resolvable:$false] %s2693_s10 }
  0x42   : > { %s2695_s13 = scalar_lea.vmem %s2694_s10, 2048  ;;  %p2696_p4 = scmp.lt.s32.totalorder %s2922_s16, %s2694_s10 }
  0x43   : > { %p2691_p8 = pnand %p2689_p2, %p2675_p11  ;;  %p2697_p12 = scmp.lt.s32.totalorder %s2695_s13, %s2688_s23 }
  0x45   : > { %p2692_p10 = pneg %p2691_p8  ;;  %p2698_p0 = por %p2697_p12, %p2696_p4 }
  0x47   : > { %p2699_p7 = pnand %p2698_p0, %p2692_p10 }
  0x49   : > { %2702 = shalt.err (!%p2699_p7)
}
  0x4a   : > { %s2782_s17 = smov 64   ;;  %s2783_s14 = smov 4  }
  0x4b   : > { %2594 = dma.hbm_to_vmem [thread:$0]  (!%p3530_p6), %s2920_s12, 1024, %s2922_s16, %s2924_s11, %s2782_s17, %s2782_s17, %s2783_s14  }
  0x4c   : > { %p3531_p11 = scmp.ne.s32.totalorder %s3527_s7, 0 }
  0x4d   : > { %p3532_p13 = scmp.eq.s32.totalorder (!%p3531_p11), %s2838_s22, 0 }
  0x4e   : > { %229 = sbr.rel (%p3531_p11) target bundleno = 604 (0x25c), region = 40 }
  0x55   : > { %2748 = dma.done.wait (%p3532_p13), [#allocation5], 64   ;;  %p3533_p3 = pmov %p3532_p13 }
  0x57   : > { %2750 = vsyncadd (%p3533_p3), [#allocation5], 4294967232  ;;  %p3534_p9 = pmov %p3533_p3 }
  0x58   : > { %p3535_p1 = pmov %p3533_p3 }
  0x59   : > { %2752 = dma.done.wait (%p3534_p9), [#allocation7], 16  }
  0x5a   : > { %2754 = vsyncadd (%p3535_p1), [#allocation7], 4294967280  ;;  %s2963_s25 = sand.u32 1, %s2769_s19   ;;  %p3536_p6 = scmp.ne.s32.totalorder %s3524_s29, 0 }
  0x5b   : > { %s2119_s7 = sshll.u32 %s2963_s25, 6  ;;  %s240_s15 = scalar_lea.sflag [#allocation3], %s2963_s25 }
  0x5c   : > { %s2967_s12 = scalar_lea.vmem [#allocation8], %s2119_s7 }
  0x5d   : > { %2756 = dma.done.wait (%p3536_p6), %s240_s15, 1024  }
  0x5e   : > { %2758 = vsyncadd (%p3536_p6), %s240_s15, 4294966272 }
  0x5f   : > { %248 = sfence }
  0x60   : > { %v2214_v0 = vld [vmem:[%s2967_s12] sm:$0xff]   ;;  %v2245_v1 = vld [vmem:[%s2967_s12 + $0x8] sm:$0xff]   ;;  %v2246_v2 = vld [vmem:[%s2967_s12 + $0x10] sm:$0xff]   ;;  %s305_s16 = sld [smem:[#allocation2]]  ;;  %vm495_vm0 = vcmask 130048   ;;  %s2977_s11 = sld [smem:[#allocation2 + $0x1]] }
  0x61   : > { %v2247_v3 = vld [vmem:[%s2967_s12 + $0x18] sm:$0xff]   ;;  %s2979_s26 = sld [smem:[#allocation2 + $0x2]]  ;;  %v2984_v4 = vld [vmem:[%s3515_s3] sm:$0xff]  ;;  %s2986_s29 = sld [smem:[#allocation2 + $0x3]]  ;;  %v2994_v5 = vunpack.c.l.bf16 %v2214_v0  ;;  %v2996_v6 = vunpack.c.h.bf16 %v2214_v0  ;;  %v2998_v7 = vunpack.c.l.bf16 %v2245_v1  ;;  %v3005_v9 = vunpack.c.h.bf16 %v2245_v1  ;;  %v2249_v13 = vld [vmem:[%s2967_s12 + $0x28] sm:$0xff]  }
  0x62   : > { %s2988_s23 = sld [smem:[#allocation6]]  ;;  %2352 = vmatprep.mubr.msk.f32.mxu0 %vm495_vm0, %v2984_v4  ;;  %2362 = vmatprep.mubr.msk.f32.mxu1 %vm495_vm0, %v2984_v4  ;;  %s3002_s10 = sld [smem:[#allocation2 + $0x81]]  ;;  %v2248_v8 = vld [vmem:[%s2967_s12 + $0x20] sm:$0xff]   ;;  %v3007_v10 = vunpack.c.l.bf16 %v2246_v2  ;;  %v3009_v11 = vunpack.c.h.bf16 %v2246_v2  ;;  %v3011_v12 = vunpack.c.l.bf16 %v2247_v3  ;;  %v2250_v14 = vld [vmem:[%s2967_s12 + $0x30] sm:$0xff]   ;;  %v3019_v15 = vunpack.c.h.bf16 %v2247_v3 }
  0x63   : > { %s3000_s28 = sld [smem:[#allocation2 + $0x80]]  ;;  %s3013_s13 = sld [smem:[#allocation2 + $0x82]]  ;;  %v3021_v16 = vunpack.c.l.bf16 %v2248_v8  ;;  %v3023_v17 = vunpack.c.h.bf16 %v2248_v8  ;;  %v3025_v18 = vunpack.c.l.bf16 %v2249_v13  ;;  %v3029_v20 = vunpack.c.h.bf16 %v2249_v13 }
  0x64   : > { %s3015_s17 = sld [smem:[#allocation2 + $0x83]]  ;;  %v3031_v21 = vunpack.c.l.bf16 %v2250_v14  ;;  %v3033_v22 = vunpack.c.h.bf16 %v2250_v14  ;;  %s3045_s14 = sld [smem:[#allocation6 + $0x1]]  ;;  %vm1964_vm1 = vcmask 261120  }
  0x65   : > { %s3047_s7 = sld [smem:[#allocation2 + $0x100]]  ;;  %s3069_s15 = sld [smem:[#allocation2 + $0x101]] }
  0x66   : > { %v3027_v19 = vstv %s305_s16  ;;  %v3040_v25 = vstv %s2977_s11  ;;  %s3071_s16 = sld [smem:[#allocation2 + $0x102]]  ;;  %s3091_s11 = sld [smem:[#allocation2 + $0x103]] }
  0x67   : > { %v307_v23 = vmul.f32 %v2994_v5, %v3027_v19  ;;  %v308_v24 = vmul.f32 %v2996_v6, %v3027_v19  ;;  %v3043_v26 = vstv %s2979_s26  ;;  %v313_v27 = vmul.f32 %v2998_v7, %v3040_v25  ;;  %s3101_s26 = sld [smem:[#allocation6 + $0x2]]  ;;  %s3103_s8 = sld [smem:[#allocation2 + $0x180]] }
  0x68   : > { %v314_v28 = vmul.f32 %v3005_v9, %v3040_v25  ;;  %v323_v29 = vmul.f32 %v3007_v10, %v3043_v26  ;;  %v324_v30 = vmul.f32 %v3009_v11, %v3043_v26  ;;  %v3058_v31 = vstv %s2986_s29  ;;  %s3111_s9 = sld [smem:[#allocation2 + $0x181]]  ;;  %s3125_s29 = sld [smem:[#allocation2 + $0x182]] }
  0x69   : > { %v3061_v32 = vstv %s2988_s23  ;;  %v3064_v33 = vstv %s3000_s28  ;;  %v3067_v34 = vstv %s3002_s10  ;;  %v317_v35 = vadd.f32 %v313_v27, %v307_v23  ;;  %s3127_s23 = sld [smem:[#allocation2 + $0x183]]  ;;  %p3537_p2 = scmp.ne.s32.totalorder %s3525_s30, 0 }
  0x6a   : > { %v318_v36 = vadd.f32 %v314_v28, %v308_v24  ;;  %v333_v37 = vmul.f32 %v3011_v12, %v3058_v31  ;;  %v334_v38 = vmul.f32 %v3019_v15, %v3058_v31  ;;  %v353_v39 = vmul.f32 %v2994_v5, %v3064_v33  ;;  %s3152_s28 = sld [smem:[#allocation6 + $0x3]] }
  0x6b   : > { %v354_v40 = vmul.f32 %v2996_v6, %v3064_v33  ;;  %v359_v41 = vmul.f32 %v2998_v7, %v3067_v34  ;;  %v360_v42 = vmul.f32 %v3005_v9, %v3067_v34  ;;  %v327_v43 = vadd.f32 %v323_v29, %v317_v35 }
  0x6c   : > { %v328_v44 = vadd.f32 %v324_v30, %v318_v36  ;;  %v3086_v45 = vstv %s3013_s13  ;;  %v3089_v46 = vstv %s3015_s17  ;;  %v3106_v57 = vstv %s3045_s14  ;;  %s2784_s17 = smov [#allocation9]  }
  0x6d   : > { %v363_v47 = vadd.f32 %v359_v41, %v353_v39  ;;  %v364_v48 = vadd.f32 %v360_v42, %v354_v40  ;;  %v369_v49 = vmul.f32 %v3007_v10, %v3086_v45  ;;  %v370_v50 = vmul.f32 %v3009_v11, %v3086_v45  ;;  %s2707_s14 = sshll.u32 %s2784_s17, 4  ;;  %s2708_s14 = int_to_ptr.vmem [resolvable:$false] %s2707_s14 }
  0x6e   : > { %v337_v51 = vadd.f32 %v333_v37, %v327_v43  ;;  %v338_v52 = vadd.f32 %v334_v38, %v328_v44  ;;  %v379_v53 = vmul.f32 %v3011_v12, %v3089_v46  ;;  %v380_v54 = vmul.f32 %v3019_v15, %v3089_v46 }
  0x6f   : > { %v373_v55 = vadd.f32 %v369_v49, %v363_v47  ;;  %v374_v56 = vadd.f32 %v370_v50, %v364_v48  ;;  %v3109_v58 = vstv %s3047_s7  ;;  %v3120_v1 = vstv %s3069_s15  ;;  %v2251_v47 = vld [vmem:[%s2967_s12 + $0x38] sm:$0xff]   ;;  %v3158_v49 = vld [vmem:[%s3515_s3 + $0x8] sm:$0xff]  ;;  %s2709_s7 = scalar_lea.vmem %s2708_s14, 8192 }
  0x70   : > { %v343_v59 = vadd.f32 %v3061_v32, %v337_v51  ;;  %v344_v60 = vadd.f32 %v3061_v32, %v338_v52  ;;  %v399_v61 = vmul.f32 %v2994_v5, %v3109_v58  ;;  %v400_v62 = vmul.f32 %v2996_v6, %v3109_v58 }
  0x71   : > { %v383_v63 = vadd.f32 %v379_v53, %v373_v55  ;;  %v384_v0 = vadd.f32 %v380_v54, %v374_v56  ;;  %v3123_v2 = vstv %s3071_s16  ;;  %v405_v13 = vmul.f32 %v2998_v7, %v3120_v1 }
  0x72   : > { %v347_v3 = vmax.f32 %v343_v59, 0.0  ;;  %v348_v8 = vmax.f32 %v344_v60, 0.0  ;;  %v406_v14 = vmul.f32 %v3005_v9, %v3120_v1  ;;  %v415_v27 = vmul.f32 %v3007_v10, %v3123_v2  ;;  %v3174_v59 = vld [vmem:[%s3515_s3 + $0x10] sm:$0xff] }
  0x73   : > { %v389_v23 = vadd.f32 %v3106_v57, %v383_v63  ;;  %v390_v24 = vadd.f32 %v3106_v57, %v384_v0  ;;  %v416_v28 = vmul.f32 %v3009_v11, %v3123_v2  ;;  %v409_v30 = vadd.f32 %v405_v13, %v399_v61 }
  0x74   : > { %v2508_v29 = vpack.c.bf16 %v348_v8, %v347_v3  ;;  %v410_v35 = vadd.f32 %v406_v14, %v400_v62  ;;  %v3140_v36 = vstv %s3091_s11  ;;  %v3147_v43 = vstv %s3101_s26  ;;  %v3203_v14 = vld [vmem:[%s3515_s3 + $0x18] sm:$0xff] }
  0x75   : > { %v393_v37 = vmax.f32 %v389_v23, 0.0  ;;  %v394_v38 = vmax.f32 %v390_v24, 0.0  ;;  %v425_v39 = vmul.f32 %v3011_v12, %v3140_v36  ;;  %v426_v40 = vmul.f32 %v3019_v15, %v3140_v36 }
  0x76   : > { %2509 = vmatprep.subr.bf16.mxu0 %v2508_v29  ;;  %v419_v41 = vadd.f32 %v415_v27, %v409_v30  ;;  %v420_v42 = vadd.f32 %v416_v28, %v410_v35  ;;  %v3150_v44 = vstv %s3103_s8  ;;  %v3165_v52 = vstv %s3111_s9  ;;  %s2120_s8 = sshll.u32 %s2963_s25, 8 }
  0x77   : > { %v2512_v48 = vpack.c.bf16 %v394_v38, %v393_v37  ;;  %2511 = vmatpush3.bf16.msra.mxu0 %v2508_v29  ;;  %v445_v50 = vmul.f32 %v2994_v5, %v3150_v44  ;;  %v446_v51 = vmul.f32 %v2996_v6, %v3150_v44  ;;  %v451_v55 = vmul.f32 %v2998_v7, %v3165_v52  ;;  %s3395_s9 = scalar_lea.vmem [#allocation9], %s2120_s8 }
  0x78   : > { %v429_v53 = vadd.f32 %v425_v39, %v419_v41  ;;  %v430_v54 = vadd.f32 %v426_v40, %v420_v42  ;;  %v452_v56 = vmul.f32 %v3005_v9, %v3165_v52  ;;  %v3177_v5 = vstv %s3125_s29  ;;  %s2212_s29 = sshll.u32 %s2838_s22, 12  ;;  %s1998_s22 = scalar_lea.sflag [#allocation4], %s2963_s25 }
  0x79   : > { %2513 = vmatprep.subr.bf16.mxu1 %v2512_v48  ;;  %v3180_v60 = vstv %s3127_s23  ;;  %v3182_v6 = vunpack.c.l.bf16 %v2251_v47  ;;  %v309_v61 = vmul.f32 %v3021_v16, %v3027_v19  ;;  %v455_v62 = vadd.f32 %v451_v55, %v445_v50  ;;  %s2012_s23 = sshll.u32 %s3395_s9, 4  ;;  %s3462_s13 = scalar_lea.hbm %s3517_s5, %s2212_s29  ;;  %s3464_s23 = int_to_ptr.vmem [resolvable:$true] %s2012_s23 }
  0x7a   : > { %2515 = vmatpush3.bf16.msra.mxu1 %v2512_v48  ;;  %2353 = vmatmul.mubr.msk.f32.vlgmr.msra.gmra.mrb[0].mxu0 %vm495_vm0, %v3158_v49  ;;  %v435_v7 = vadd.f32 %v3147_v43, %v429_v53  ;;  %v436_v9 = vadd.f32 %v3147_v43, %v430_v54  ;;  %v3190_v63 = vunpack.c.h.bf16 %v2251_v47  ;;  %v456_v0 = vadd.f32 %v452_v56, %v446_v51  ;;  %s2703_s12 = scalar_lea.vmem %s3464_s23, 4096  ;;  %p2710_p4 = scmp.lt.s32.totalorder %s3464_s23, %s2708_s14 }
  0x7b   : > { %v461_v3 = vmul.f32 %v3007_v10, %v3177_v5  ;;  %v462_v8 = vmul.f32 %v3009_v11, %v3177_v5  ;;  %v471_v13 = vmul.f32 %v3011_v12, %v3180_v60  ;;  %2355 = vmatprep.mubr.msk.f32.mxu0 %vm495_vm0, %v3174_v59  ;;  %v472_v27 = vmul.f32 %v3019_v15, %v3180_v60  ;;  %p2704_p5 = scmp.ne.s32.totalorder %s3464_s23, %s2703_s12  ;;  %p2711_p12 = scmp.lt.s32.totalorder %s2709_s7, %s2703_s12 }
  0x7c   : > { %v439_v23 = vmax.f32 %v435_v7, 0.0  ;;  %v440_v24 = vmax.f32 %v436_v9, 0.0  ;;  %v310_v10 = vmul.f32 %v3023_v17, %v3027_v19  ;;  %v315_v28 = vmul.f32 %v3025_v18, %v3040_v25 }
  0x7d   : > { %2363 = vmatmul.mubr.msk.f32.vlgmr.msra.gmra.mrb[0].mxu1 %vm495_vm0, %v3158_v49  ;;  %v465_v11 = vadd.f32 %v461_v3, %v455_v62  ;;  %v466_v12 = vadd.f32 %v462_v8, %v456_v0  ;;  %v316_v29 = vmul.f32 %v3029_v20, %v3040_v25  ;;  %v3216_v35 = vstv %s3152_s28  ;;  %p2705_p8 = pnand %p2704_p5, %p3537_p2  ;;  %p2712_p0 = por %p2711_p12, %p2710_p4 }
  0x7e   : > { %v2516_v30 = vpack.c.bf16 %v440_v24, %v439_v23  ;;  %2365 = vmatprep.mubr.msk.f32.mxu1 %vm495_vm0, %v3174_v59  ;;  %2356 = vmatmul.mubr.msk.f32.gmra.mrb[2].mxu0 %vm495_vm0, %v3203_v14  ;;  %v325_v15 = vmul.f32 %v3031_v21, %v3043_v26  ;;  %v326_v19 = vmul.f32 %v3033_v22, %v3043_v26 }
  0x7f   : > { %v475_v37 = vadd.f32 %v471_v13, %v465_v11  ;;  %v476_v38 = vadd.f32 %v472_v27, %v466_v12  ;;  %2372 = vmatprep.mubr.msk.f32.mxu0 %vm495_vm0, %v2984_v4  ;;  %v319_v25 = vadd.f32 %v315_v28, %v309_v61  ;;  %v320_v39 = vadd.f32 %v316_v29, %v310_v10  ;;  %p2706_p10 = pneg %p2705_p8 }
  0x80   : > { %2517 = vmatprep.subr.bf16.mxu0 %v2516_v30  ;;  %v335_v40 = vmul.f32 %v3182_v6, %v3058_v31  ;;  %v336_v41 = vmul.f32 %v3190_v63, %v3058_v31  ;;  %v355_v42 = vmul.f32 %v3021_v16, %v3064_v33  ;;  %v356_v26 = vmul.f32 %v3023_v17, %v3064_v33 }
  0x81   : > { %v481_v47 = vadd.f32 %v3216_v35, %v475_v37  ;;  %v482_v48 = vadd.f32 %v3216_v35, %v476_v38  ;;  %2519 = vmatpush3.bf16.msra.mxu0 %v2516_v30  ;;  %2366 = vmatmul.mubr.msk.f32.gmra.mrb[2].mxu1 %vm495_vm0, %v3203_v14  ;;  %v329_v50 = vadd.f32 %v325_v15, %v319_v25  ;;  %p2713_p7 = pnand %p2712_p0, %p2706_p10 }
  0x82   : > { %2382 = vmatprep.mubr.msk.f32.mxu1 %vm495_vm0, %v2984_v4  ;;  %v330_v51 = vadd.f32 %v326_v19, %v320_v39  ;;  %v361_v31 = vmul.f32 %v3025_v18, %v3067_v34  ;;  %v362_v53 = vmul.f32 %v3029_v20, %v3067_v34  ;;  %v371_v33 = vmul.f32 %v3031_v21, %v3086_v45 }
  0x83   : > { %v485_v54 = vmax.f32 %v481_v47, 0.0  ;;  %v486_v55 = vmax.f32 %v482_v48, 0.0  ;;  %v339_v56 = vadd.f32 %v335_v40, %v329_v50  ;;  %v372_v61 = vmul.f32 %v3033_v22, %v3086_v45 }
  0x84   : > { %2373 = vmatmul.mubr.msk.f32.vlgmr.msra.gmra.mrb[4].mxu0 %vm495_vm0, %v3158_v49  ;;  %v340_v7 = vadd.f32 %v336_v41, %v330_v51  ;;  %v365_v9 = vadd.f32 %v361_v31, %v355_v42  ;;  %v366_v62 = vadd.f32 %v362_v53, %v356_v26  ;;  %v381_v0 = vmul.f32 %v3182_v6, %v3089_v46 }
  0x85   : > { %v2520_v3 = vpack.c.bf16 %v486_v55, %v485_v54  ;;  %v345_v34 = vadd.f32 %v3061_v32, %v339_v56  ;;  %v382_v8 = vmul.f32 %v3190_v63, %v3089_v46  ;;  %2375 = vmatprep.mubr.msk.f32.mxu0 %vm495_vm0, %v3174_v59  ;;  %v401_v45 = vmul.f32 %v3021_v16, %v3109_v58 }
  0x86   : > { %v346_v13 = vadd.f32 %v3061_v32, %v340_v7  ;;  %v375_v23 = vadd.f32 %v371_v33, %v365_v9  ;;  %v376_v24 = vadd.f32 %v372_v61, %v366_v62  ;;  %v402_v27 = vmul.f32 %v3023_v17, %v3109_v58 }
  0x87   : > { %2521 = vmatprep.subr.bf16.mxu1 %v2520_v3  ;;  %v349_v10 = vmax.f32 %v345_v34, 0.0  ;;  %v407_v11 = vmul.f32 %v3025_v18, %v3120_v1  ;;  %v408_v46 = vmul.f32 %v3029_v20, %v3120_v1  ;;  %v417_v12 = vmul.f32 %v3031_v21, %v3123_v2 }
  0x88   : > { %2523 = vmatpush3.bf16.msra.mxu1 %v2520_v3  ;;  %v350_v28 = vmax.f32 %v346_v13, 0.0  ;;  %v385_v29 = vadd.f32 %v381_v0, %v375_v23  ;;  %v386_v32 = vadd.f32 %v382_v8, %v376_v24  ;;  %2376 = vmatmul.mubr.msk.f32.gmra.mrb[6].mxu0 %vm495_vm0, %v3203_v14  ;;  %v418_v58 = vmul.f32 %v3033_v22, %v3123_v2 }
  0x89   : > { %2392 = vmatprep.mubr.msk.f32.mxu0 %vm495_vm0, %v2984_v4  ;;  %v411_v30 = vadd.f32 %v407_v11, %v401_v45  ;;  %v412_v15 = vadd.f32 %v408_v46, %v402_v27  ;;  %v427_v1 = vmul.f32 %v3182_v6, %v3140_v36  ;;  %v428_v19 = vmul.f32 %v3190_v63, %v3140_v36 }
  0x8a   : > { %v2524_v37 = vpack.c.bf16 %v350_v28, %v349_v10  ;;  %v391_v38 = vadd.f32 %v3106_v57, %v385_v29  ;;  %v392_v25 = vadd.f32 %v3106_v57, %v386_v32  ;;  %v447_v39 = vmul.f32 %v3021_v16, %v3150_v44 }
  0x8b   : > { %2383 = vmatmul.mubr.msk.f32.vlgmr.msra.gmra.mrb[4].mxu1 %vm495_vm0, %v3158_v49  ;;  %v421_v2 = vadd.f32 %v417_v12, %v411_v30  ;;  %v422_v40 = vadd.f32 %v418_v58, %v412_v15  ;;  %v448_v41 = vmul.f32 %v3023_v17, %v3150_v44  ;;  %v453_v42 = vmul.f32 %v3025_v18, %v3165_v52 }
  0x8c   : > { %2525 = vmatprep.subr.bf16.mxu0 %v2524_v37  ;;  %v395_v36 = vmax.f32 %v391_v38, 0.0  ;;  %v396_v26 = vmax.f32 %v392_v25, 0.0  ;;  %2385 = vmatprep.mubr.msk.f32.mxu1 %vm495_vm0, %v3174_v59  ;;  %v454_v16 = vmul.f32 %v3029_v20, %v3165_v52  ;;  %v463_v57 = vmul.f32 %v3031_v21, %v3177_v5 }
  0x8d   : > { %2527 = vmatpush3.bf16.msra.mxu0 %v2524_v37  ;;  %v431_v47 = vadd.f32 %v427_v1, %v421_v2  ;;  %v432_v48 = vadd.f32 %v428_v19, %v422_v40  ;;  %v457_v50 = vadd.f32 %v453_v42, %v447_v39  ;;  %v464_v17 = vmul.f32 %v3033_v22, %v3177_v5  ;;  %v493_v5 = vld [vmem:[%s3516_s4] sm:$0xff] }
  0x8e   : > { %v2528_v18 = vpack.c.bf16 %v396_v26, %v395_v36  ;;  %v458_v44 = vadd.f32 %v454_v16, %v448_v41  ;;  %v473_v51 = vmul.f32 %v3182_v6, %v3180_v60  ;;  %v474_v31 = vmul.f32 %v3190_v63, %v3180_v60  ;;  %v494_v60 = vld [vmem:[%s3516_s4 + $0x8] sm:$0xff] }
  0x8f   : > { %2386 = vmatmul.mubr.msk.f32.gmra.mrb[6].mxu1 %vm495_vm0, %v3203_v14  ;;  %v437_v20 = vadd.f32 %v3147_v43, %v431_v47  ;;  %v438_v21 = vadd.f32 %v3147_v43, %v432_v48  ;;  %v467_v52 = vadd.f32 %v463_v57, %v457_v50  ;;  %v3319_v55 = vpack.c.bf16 %v494_v60, %v493_v5 }
  0x90   : > { %2529 = vmatprep.subr.bf16.mxu1 %v2528_v18  ;;  %2402 = vmatprep.mubr.msk.f32.mxu1 %vm495_vm0, %v2984_v4  ;;  %v468_v22 = vadd.f32 %v464_v17, %v458_v44 }
  0x91   : > { %2531 = vmatpush3.bf16.msra.mxu1 %v2528_v18  ;;  %2393 = vmatmul.mubr.msk.f32.vlgmr.msra.gmra.mrb[8].mxu0 %vm495_vm0, %v3158_v49  ;;  %v441_v6 = vmax.f32 %v437_v20, 0.0  ;;  %v442_v43 = vmax.f32 %v438_v21, 0.0  ;;  %v477_v63 = vadd.f32 %v473_v51, %v467_v52 }
  0x92   : > { %v478_v53 = vadd.f32 %v474_v31, %v468_v22  ;;  %2395 = vmatprep.mubr.msk.f32.mxu0 %vm495_vm0, %v3174_v59 }
  0x93   : > { %v2532_v33 = vpack.c.bf16 %v442_v43, %v441_v6  ;;  %v483_v54 = vadd.f32 %v3216_v35, %v477_v63 }
  0x94   : > { %2403 = vmatmul.mubr.msk.f32.vlgmr.msra.gmra.mrb[8].mxu1 %vm495_vm0, %v3158_v49  ;;  %v484_v56 = vadd.f32 %v3216_v35, %v478_v53 }
  0x95   : > { %2533 = vmatprep.subr.bf16.mxu0 %v2532_v33  ;;  %v487_v61 = vmax.f32 %v483_v54, 0.0  ;;  %2405 = vmatprep.mubr.msk.f32.mxu1 %vm495_vm0, %v3174_v59 }
  0x96   : > { %v488_v7 = vmax.f32 %v484_v56, 0.0  ;;  %2535 = vmatpush3.bf16.msra.mxu0 %v2532_v33 }
  0x97   : > { %2396 = vmatmul.mubr.msk.f32.gmra.mrb[10].mxu0 %vm495_vm0, %v3203_v14  ;;  %2541 = vmatprep.subr.bf16.mxu0 %v3319_v55 }
  0x98   : > { %v2536_v9 = vpack.c.bf16 %v488_v7, %v487_v61  ;;  %2406 = vmatmul.mubr.msk.f32.gmra.mrb[10].mxu1 %vm495_vm0, %v3203_v14  ;;  %2412 = vmatprep.mubr.msk.f32.mxu0 %vm495_vm0, %v2984_v4 }
  0x99   : > { %2422 = vmatprep.mubr.msk.f32.mxu1 %vm495_vm0, %v2984_v4 }
  0x9a   : > { %2537 = vmatprep.subr.bf16.mxu1 %v2536_v9 }
  0x9b   : > { %2539 = vmatpush3.bf16.msra.mxu1 %v2536_v9  ;;  %2413 = vmatmul.mubr.msk.f32.vlgmr.msra.gmra.mrb[12].mxu0 %vm495_vm0, %v3158_v49 }
  0x9c   : > { %2415 = vmatprep.mubr.msk.f32.mxu0 %vm495_vm0, %v3174_v59  ;;  %2545 = vmatprep.subr.bf16.mxu1 %v3319_v55 }
  0x9d   : > { %2543 = vmatpush3.bf16.msra.mxu0 %v3319_v55 }
  0x9e   : > { %2423 = vmatmul.mubr.msk.f32.vlgmr.msra.gmra.mrb[12].mxu1 %vm495_vm0, %v3158_v49  ;;  %2549 = vmatprep.subr.bf16.mxu0 %v3319_v55 }
  0x9f   : > { %2425 = vmatprep.mubr.msk.f32.mxu1 %vm495_vm0, %v3174_v59  ;;  %2416 = vmatmul.mubr.msk.f32.gmra.mrb[14].mxu0 %vm495_vm0, %v3203_v14 }
  0xa0   : > { %2547 = vmatpush3.bf16.msra.mxu1 %v3319_v55 }
  0xa1   : > { %2553 = vmatprep.subr.bf16.mxu1 %v3319_v55 }
  0xa2   : > { %2426 = vmatmul.mubr.msk.f32.gmra.mrb[14].mxu1 %vm495_vm0, %v3203_v14 }
 0x14d   : > { %v2354_v4 = vpop.f32.mrb[0].mxu0 }
 0x14e   : > { %v574_v35 = vpop.f32.mrb[1].mxu0 }
 0x14f   : > { %2432 = vmatprep.mubr.msk.f32.mxu0 %vm495_vm0, %v574_v35 }
 0x150   : > { %v2364_v49 = vpop.f32.mrb[0].mxu1  ;;  %2433 = vmatmul.mubr.msk.f32.vlgmr.msra.gmra.mrb[16].mxu0 %vm495_vm0, %v2354_v4 }
 0x151   : > { %v659_v62 = vpop.f32.mrb[1].mxu1  ;;  %v2357_v0 = vpop.f32.mrb[2].mxu0  ;;  %2551 = vmatpush3.bf16.msra.mxu0 %v3319_v55 }
 0x152   : > { %2442 = vmatprep.mubr.msk.f32.mxu1 %vm495_vm0, %v659_v62  ;;  %v584_v59 = vpop.f32.mrb[3].mxu0  ;;  %2557 = vmatprep.subr.bf16.mxu0 %v3319_v55 }
 0x153   : > { %2443 = vmatmul.mubr.msk.f32.vlgmr.msra.gmra.mrb[16].mxu1 %vm495_vm0, %v2364_v49  ;;  %2435 = vmatprep.mubr.msk.f32.mxu0 %vm495_vm0, %v584_v59 }
 0x154   : > { %v2367_v14 = vpop.f32.mrb[2].mxu1  ;;  %2555 = vmatpush3.bf16.msra.mxu1 %v3319_v55  ;;  %2436 = vmatmul.mubr.msk.f32.gmra.mrb[18].mxu0 %vm495_vm0, %v2357_v0 }
 0x155   : > { %v669_v3 = vpop.f32.mrb[3].mxu1  ;;  %2561 = vmatprep.subr.bf16.mxu1 %v3319_v55 }
 0x156   : > { %2445 = vmatprep.mubr.msk.f32.mxu1 %vm495_vm0, %v669_v3 }
 0x157   : > { %2446 = vmatmul.mubr.msk.f32.gmra.mrb[18].mxu1 %vm495_vm0, %v2367_v14  ;;  %v2374_v34 = vpop.f32.mrb[4].mxu0 }
 0x158   : > { %v744_v8 = vpop.f32.mrb[5].mxu0 }
 0x159   : > { %2452 = vmatprep.mubr.msk.f32.mxu0 %vm495_vm0, %v744_v8 }
 0x15a   : > { %2453 = vmatmul.mubr.msk.f32.vlgmr.msra.gmra.mrb[20].mxu0 %vm495_vm0, %v2374_v34 }
 0x15b   : > { %v2377_v45 = vpop.f32.mrb[6].mxu0  ;;  %2559 = vmatpush3.bf16.msra.mxu0 %v3319_v55 }
 0x15c   : > { %v754_v13 = vpop.f32.mrb[7].mxu0  ;;  %2565 = vmatprep.subr.bf16.mxu0 %v3319_v55 }
 0x15d   : > { %2455 = vmatprep.mubr.msk.f32.mxu0 %vm495_vm0, %v754_v13 }
 0x15e   : > { %v2384_v23 = vpop.f32.mrb[4].mxu1  ;;  %2456 = vmatmul.mubr.msk.f32.gmra.mrb[22].mxu0 %vm495_vm0, %v2377_v45 }
 0x15f   : > { %v829_v24 = vpop.f32.mrb[5].mxu1 }
 0x160   : > { %2462 = vmatprep.mubr.msk.f32.mxu1 %vm495_vm0, %v829_v24 }
 0x161   : > { %2463 = vmatmul.mubr.msk.f32.vlgmr.msra.gmra.mrb[20].mxu1 %vm495_vm0, %v2384_v23 }
 0x162   : > { %v2387_v27 = vpop.f32.mrb[6].mxu1  ;;  %2563 = vmatpush3.bf16.msra.mxu1 %v3319_v55 }
 0x163   : > { %v839_v10 = vpop.f32.mrb[7].mxu1  ;;  %2569 = vmatprep.subr.bf16.mxu1 %v3319_v55 }
 0x164   : > { %2465 = vmatprep.mubr.msk.f32.mxu1 %vm495_vm0, %v839_v10  ;;  %v2394_v11 = vpop.f32.mrb[8].mxu0 }
 0x165   : > { %2466 = vmatmul.mubr.msk.f32.gmra.mrb[22].mxu1 %vm495_vm0, %v2387_v27  ;;  %v914_v46 = vpop.f32.mrb[9].mxu0 }
 0x166   : > { %2472 = vmatprep.mubr.msk.f32.mxu0 %vm495_vm0, %v914_v46 }
 0x167   : > { %v2404_v12 = vpop.f32.mrb[8].mxu1  ;;  %2473 = vmatmul.mubr.msk.f32.vlgmr.msra.gmra.mrb[24].mxu0 %vm495_vm0, %v2394_v11 }
 0x168   : > { %v999_v28 = vpop.f32.mrb[9].mxu1  ;;  %2567 = vmatpush3.bf16.msra.mxu0 %v3319_v55 }
 0x169   : > { %2482 = vmatprep.mubr.msk.f32.mxu1 %vm495_vm0, %v999_v28 }
 0x16a   : > { %2483 = vmatmul.mubr.msk.f32.vlgmr.msra.gmra.mrb[24].mxu1 %vm495_vm0, %v2404_v12  ;;  %v2397_v29 = vpop.f32.mrb[10].mxu0 }
 0x16b   : > { %v2407_v32 = vpop.f32.mrb[10].mxu1  ;;  %2571 = vmatpush3.bf16.msra.mxu1 %v3319_v55  ;;  %v924_v58 = vpop.f32.mrb[11].mxu0 }
 0x16c   : > { %v1009_v30 = vpop.f32.mrb[11].mxu1  ;;  %2475 = vmatprep.mubr.msk.f32.mxu0 %vm495_vm0, %v924_v58 }
 0x16d   : > { %2485 = vmatprep.mubr.msk.f32.mxu1 %vm495_vm0, %v1009_v30  ;;  %2476 = vmatmul.mubr.msk.f32.gmra.mrb[26].mxu0 %vm495_vm0, %v2397_v29 }
 0x16e   : > { %2486 = vmatmul.mubr.msk.f32.gmra.mrb[26].mxu1 %vm495_vm0, %v2407_v32  ;;  %v2414_v15 = vpop.f32.mrb[12].mxu0 }
 0x16f   : > { %v1084_v1 = vpop.f32.mrb[13].mxu0 }
 0x170   : > { %2492 = vmatprep.mubr.msk.f32.mxu0 %vm495_vm0, %v1084_v1 }
 0x171   : > { %v2424_v19 = vpop.f32.mrb[12].mxu1  ;;  %2493 = vmatmul.mubr.msk.f32.vlgmr.msra.gmra.mrb[28].mxu0 %vm495_vm0, %v2414_v15 }
 0x172   : > { %v1169_v37 = vpop.f32.mrb[13].mxu1  ;;  %v2417_v38 = vpop.f32.mrb[14].mxu0 }
 0x173   : > { %2502 = vmatprep.mubr.msk.f32.mxu1 %vm495_vm0, %v1169_v37  ;;  %v1094_v25 = vpop.f32.mrb[15].mxu0 }
 0x174   : > { %2503 = vmatmul.mubr.msk.f32.vlgmr.msra.gmra.mrb[28].mxu1 %vm495_vm0, %v2424_v19  ;;  %2495 = vmatprep.mubr.msk.f32.mxu0 %vm495_vm0, %v1094_v25 }
 0x175   : > { %v2427_v39 = vpop.f32.mrb[14].mxu1  ;;  %2496 = vmatmul.mubr.msk.f32.gmra.mrb[30].mxu0 %vm495_vm0, %v2417_v38 }
 0x176   : > { %v1179_v2 = vpop.f32.mrb[15].mxu1 }
 0x177   : > { %2505 = vmatprep.mubr.msk.f32.mxu1 %vm495_vm0, %v1179_v2 }
 0x178   : > { %2506 = vmatmul.mubr.msk.f32.gmra.mrb[30].mxu1 %vm495_vm0, %v2427_v39 }
 0x223   : > { %v2434_v40 = vpop.f32.mrb[16].mxu0 }
 0x224   : > { %1966 = vst.msk [vmem:[%s3395_s9 + $0x8] sm:$0xff] %vm1964_vm1, %v2434_v40  ;;  %v1266_v41 = vpop.f32.mrb[17].mxu0 }
 0x225   : > { %1965 = vst.msk [vmem:[%s3395_s9] sm:$0xff] %vm1964_vm1, %v1266_v41 }
 0x226   : > { %v2444_v42 = vpop.f32.mrb[16].mxu1 }
 0x227   : > { %1970 = vst.msk [vmem:[%s3395_s9 + $0x28] sm:$0xff] %vm1964_vm1, %v2444_v42  ;;  %v1363_v36 = vpop.f32.mrb[17].mxu1  ;;  %v2437_v26 = vpop.f32.mrb[18].mxu0 }
 0x228   : > { %1969 = vst.msk [vmem:[%s3395_s9 + $0x20] sm:$0xff] %vm1964_vm1, %v1363_v36  ;;  %1968 = vst.msk [vmem:[%s3395_s9 + $0x18] sm:$0xff] %vm1964_vm1, %v2437_v26  ;;  %v1276_v16 = vpop.f32.mrb[19].mxu0 }
 0x229   : > { %1967 = vst.msk [vmem:[%s3395_s9 + $0x10] sm:$0xff] %vm1964_vm1, %v1276_v16 }
 0x22a   : > { %v2447_v57 = vpop.f32.mrb[18].mxu1 }
 0x22b   : > { %1972 = vst.msk [vmem:[%s3395_s9 + $0x38] sm:$0xff] %vm1964_vm1, %v2447_v57  ;;  %v1373_v47 = vpop.f32.mrb[19].mxu1 }
 0x22c   : > { %1971 = vst.msk [vmem:[%s3395_s9 + $0x30] sm:$0xff] %vm1964_vm1, %v1373_v47 }
 0x22d   : > { %v2454_v48 = vpop.f32.mrb[20].mxu0 }
 0x22e   : > { %1974 = vst.msk [vmem:[%s3395_s9 + $0x48] sm:$0xff] %vm1964_vm1, %v2454_v48  ;;  %v1460_v50 = vpop.f32.mrb[21].mxu0 }
 0x22f   : > { %1973 = vst.msk [vmem:[%s3395_s9 + $0x40] sm:$0xff] %vm1964_vm1, %v1460_v50 }
 0x231   : > { %v2457_v17 = vpop.f32.mrb[22].mxu0 }
 0x232   : > { %1976 = vst.msk [vmem:[%s3395_s9 + $0x58] sm:$0xff] %vm1964_vm1, %v2457_v17  ;;  %v1470_v18 = vpop.f32.mrb[23].mxu0 }
 0x233   : > { %1975 = vst.msk [vmem:[%s3395_s9 + $0x50] sm:$0xff] %vm1964_vm1, %v1470_v18 }
 0x234   : > { %v2464_v44 = vpop.f32.mrb[20].mxu1 }
 0x235   : > { %1978 = vst.msk [vmem:[%s3395_s9 + $0x68] sm:$0xff] %vm1964_vm1, %v2464_v44  ;;  %v1557_v51 = vpop.f32.mrb[21].mxu1 }
 0x236   : > { %1977 = vst.msk [vmem:[%s3395_s9 + $0x60] sm:$0xff] %vm1964_vm1, %v1557_v51 }
 0x238   : > { %v2467_v31 = vpop.f32.mrb[22].mxu1 }
 0x239   : > { %1980 = vst.msk [vmem:[%s3395_s9 + $0x78] sm:$0xff] %vm1964_vm1, %v2467_v31  ;;  %v1567_v20 = vpop.f32.mrb[23].mxu1 }
 0x23a   : > { %1979 = vst.msk [vmem:[%s3395_s9 + $0x70] sm:$0xff] %vm1964_vm1, %v1567_v20  ;;  %v2474_v21 = vpop.f32.mrb[24].mxu0 }
 0x23b   : > { %1982 = vst.msk [vmem:[%s3395_s9 + $0x88] sm:$0xff] %vm1964_vm1, %v2474_v21  ;;  %v1654_v52 = vpop.f32.mrb[25].mxu0 }
 0x23c   : > { %1981 = vst.msk [vmem:[%s3395_s9 + $0x80] sm:$0xff] %vm1964_vm1, %v1654_v52 }
 0x23d   : > { %v2484_v22 = vpop.f32.mrb[24].mxu1 }
 0x23e   : > { %1986 = vst.msk [vmem:[%s3395_s9 + $0xa8] sm:$0xff] %vm1964_vm1, %v2484_v22  ;;  %v1751_v5 = vpop.f32.mrb[25].mxu1 }
 0x23f   : > { %1985 = vst.msk [vmem:[%s3395_s9 + $0xa0] sm:$0xff] %vm1964_vm1, %v1751_v5 }
 0x240   : > { %v2477_v60 = vpop.f32.mrb[26].mxu0 }
 0x241   : > { %1984 = vst.msk [vmem:[%s3395_s9 + $0x98] sm:$0xff] %vm1964_vm1, %v2477_v60  ;;  %v2487_v6 = vpop.f32.mrb[26].mxu1  ;;  %v1664_v43 = vpop.f32.mrb[27].mxu0 }
 0x242   : > { %1988 = vst.msk [vmem:[%s3395_s9 + $0xb8] sm:$0xff] %vm1964_vm1, %v2487_v6  ;;  %1983 = vst.msk [vmem:[%s3395_s9 + $0x90] sm:$0xff] %vm1964_vm1, %v1664_v43  ;;  %v1761_v63 = vpop.f32.mrb[27].mxu1 }
 0x243   : > { %1987 = vst.msk [vmem:[%s3395_s9 + $0xb0] sm:$0xff] %vm1964_vm1, %v1761_v63 }
 0x244   : > { %v2494_v53 = vpop.f32.mrb[28].mxu0 }
 0x245   : > { %1990 = vst.msk [vmem:[%s3395_s9 + $0xc8] sm:$0xff] %vm1964_vm1, %v2494_v53  ;;  %v1848_v33 = vpop.f32.mrb[29].mxu0 }
 0x246   : > { %1989 = vst.msk [vmem:[%s3395_s9 + $0xc0] sm:$0xff] %vm1964_vm1, %v1848_v33 }
 0x247   : > { %v2504_v54 = vpop.f32.mrb[28].mxu1 }
 0x248   : > { %1994 = vst.msk [vmem:[%s3395_s9 + $0xe8] sm:$0xff] %vm1964_vm1, %v2504_v54  ;;  %v1945_v55 = vpop.f32.mrb[29].mxu1  ;;  %v2497_v56 = vpop.f32.mrb[30].mxu0 }
 0x249   : > { %1993 = vst.msk [vmem:[%s3395_s9 + $0xe0] sm:$0xff] %vm1964_vm1, %v1945_v55  ;;  %1992 = vst.msk [vmem:[%s3395_s9 + $0xd8] sm:$0xff] %vm1964_vm1, %v2497_v56  ;;  %v1858_v61 = vpop.f32.mrb[31].mxu0 }
 0x24a   : > { %1991 = vst.msk [vmem:[%s3395_s9 + $0xd0] sm:$0xff] %vm1964_vm1, %v1858_v61 }
 0x24b   : > { %v2507_v7 = vpop.f32.mrb[30].mxu1 }
 0x24c   : > { %1996 = vst.msk [vmem:[%s3395_s9 + $0xf8] sm:$0xff] %vm1964_vm1, %v2507_v7  ;;  %v1955_v9 = vpop.f32.mrb[31].mxu1 }
 0x24d   : > { %1995 = vst.msk [vmem:[%s3395_s9 + $0xf0] sm:$0xff] %vm1964_vm1, %v1955_v9 }
 0x24e   : > { %2716 = shalt.err (!%p2713_p7)
}
 0x24f   : > { %s2717_s15 = scalar_lea.hbm %s3462_s13, 4096  ;;  %s2721_s26 = scalar_lea.hbm %s3517_s5, 8192 }
 0x250   : > { %p2718_p11 = scmp.ne.s32.totalorder %s3462_s13, %s2717_s15  ;;  %p2722_p9 = scmp.lt.u32.totalorder %s3462_s13, %s3517_s5 }
 0x251   : > { %p2723_p1 = scmp.lt.u32.totalorder %s2721_s26, %s2717_s15  ;;  %p2725_p5 = scmp.lt.u32.totalorder %s2717_s15, %s3462_s13 }
 0x252   : > { %p2719_p13 = pnand %p2718_p11, %p3537_p2 }
 0x253   : > { %p2724_p6 = por %p2723_p1, %p2722_p9 }
 0x254   : > { %p2720_p3 = pneg %p2719_p13 }
 0x255   : > { %p2726_p8 = por %p2725_p5, %p2724_p6 }
 0x257   : > { %p2727_p10 = pnand %p2726_p8, %p2720_p3 }
 0x259   : > { %2730 = shalt.err (!%p2727_p10)
}
 0x25a   : > { %s2785_s29 = smov 128   ;;  %s2786_s28 = smov 8  }
 0x25b   : > { %2582 = dma.vmem_to_hbm [thread:$0]  (%p3537_p2), %s3464_s23, 4096, %s3462_s13, %s1998_s22, %s2785_s29, %s2785_s29, %s2786_s28  }
 0x25c PF: > { %s2027_s10 = sand.u32 1, %s2765_s18   ;;  %p3538_p4 = scmp.ne.s32.totalorder %s3526_s6, 0 }
 0x25d   : > { %p3539_p12 = scmp.ge.s32.totalorder %s2777_s21, 2  ;;  %s2028_s12 = scalar_lea.sflag [#allocation4], %s2027_s10 }
 0x25f   : > { %p2596_p0 = pnand %p3539_p12, %p3538_p4 }
 0x261   : > { %2760 = dma.done.wait (!%p2596_p0), %s2028_s12, 4096  }
 0x262   : > { %2762 = vsyncadd (!%p2596_p0), %s2028_s12, 4294963200  ;;  %p20_p7 = scmp.ge.s32.totalorder %s2842_s24, 4   ;;  %s3540_s18 = smov %s2769_s19 }
 0x263   : > { %s3541_s19 = smov %s2773_s20  ;;  %s3542_s20 = smov %s2854_s27 }
 0x264   : > { %s3543_s21 = smov %s2842_s24  ;;  %22 = sbr.rel (!%p20_p7) target bundleno = 7 (0x7), region = 94 }
 0x26b   :  { %2033 = vsyncpa [#allocation3], 1 }
 0x26c   :  { %2035 = vsyncpa [#allocation3 + $0x1], 1 }
 0x26d   :  { %2036 = vsyncpa [#allocation4], 1 }
 0x26e   :  { %2038 = vsyncpa [#allocation4 + $0x1], 1 }
 0x26f   :  { %2039 = vsyncpa [#allocation5], 1 }
 0x270   :  { %2041 = vsyncpa [#allocation5 + $0x1], 1 }
 0x271   :  { %2042 = vsyncpa [#allocation7], 1 }

</bundles_post_ra>
